<compile_context>
chip_gen: v7x
topology: tpu7x:2x2x1
jax: 0.10.0
libtpu: 0.0.40
codegen_flags: <defaults>
</compile_context>

<pallas_src>
import functools
import math

import jax
import jax.numpy as jnp
from jax.experimental import pallas as pl
from jax.experimental.pallas import tpu as pltpu


def sine_kernel(x_ref, o_ref, *, w0):
    # Upcast to f32 so the 30x scale + sin range reduction stay accurate for
    # bf16/f16 inputs (free on v5e/v6e, which have no bf16 VPU/EUP anyway).
    x = x_ref[...].astype(jnp.float32)
    o_ref[...] = jnp.sin(jnp.float32(w0) * x).astype(o_ref.dtype)


def _row_tile(rows, max_rows, sublane):
    """Row-tile choice: sublane-aligned, and >=2 grid steps when feasible
    so both v7x TensorCores get work under ("parallel",) semantics."""
    if rows > max_rows:
        return max_rows                      # grid >= 2 automatically
    if rows >= 2 * sublane:
        half = math.ceil(rows / 2)
        return math.ceil(half / sublane) * sublane   # ~2 blocks (last may be ragged)
    return rows                              # tiny: single full-extent block


def _sine_call(x2, w0, tm):
    rows, lane = x2.shape
    dtype = x2.dtype
    nbytes = rows * lane * jnp.dtype(dtype).itemsize
    return pl.pallas_call(
        functools.partial(sine_kernel, w0=float(w0)),
        out_shape=jax.ShapeDtypeStruct((rows, lane), dtype),
        grid_spec=pltpu.PrefetchScalarGridSpec(
            num_scalar_prefetch=0,
            grid=(pl.cdiv(rows, tm),),
            in_specs=[pl.BlockSpec((tm, lane), lambda i: (i, 0))],
            out_specs=pl.BlockSpec((tm, lane), lambda i: (i, 0)),
        ),
        compiler_params=pltpu.CompilerParams(
            dimension_semantics=("parallel",),   # shards grid across v7x's 2 TCs
        ),
        cost_estimate=pl.CostEstimate(
            flops=rows * lane,                   # one multiply per element
            transcendentals=rows * lane,         # one sin per element
            bytes_accessed=2 * nbytes,
        ),
    )(x2)


@functools.partial(jax.jit, static_argnames=("w0", "max_rows", "lane"))
def sine(x, w0=30.0, *, max_rows=512, lane=512):
    """Pallas TPU implementation of Sine.forward: sin(w0 * x), any shape."""
    orig_shape = x.shape
    dtype = x.dtype
    total = math.prod(orig_shape)
    if total == 0:
        return x
    if lane % 128 != 0:
        lane = 512

    itemsize = jnp.dtype(dtype).itemsize
    pack = max(1, 4 // itemsize)             # 1 f32, 2 bf16, 4 int8
    sublane = 8 * pack                       # min sublane tile for this dtype
    max_rows_eff = max_rows * pack           # keep block bytes ~constant (~1 MiB)

    flat = x.reshape(-1)

    # ---- Fast path: no pad / no tail-slice when a lane width divides total ----
    for lane_cand in (lane, 512, 256, 128):
        if lane_cand % 128 == 0 and total % lane_cand == 0:
            rows = total // lane_cand
            tm = _row_tile(rows, max_rows_eff, sublane)
            out2 = _sine_call(flat.reshape(rows, lane_cand), w0, tm)
            return out2.reshape(orig_shape)

    # ---- Tiny ragged sizes: single full-extent block, still no pad ----
    if total < 128:
        out2 = _sine_call(flat.reshape(1, total), w0, 1)
        return out2.reshape(orig_shape)

    # ---- Ragged fallback: pad only to the next multiple of `lane` ----
    padded = math.ceil(total / lane) * lane
    flat_p = jnp.pad(flat, (0, padded - total))       # sin(0)=0 tail, sliced off below
    rows = padded // lane
    tm = _row_tile(rows, max_rows_eff, sublane)
    out2 = _sine_call(flat_p.reshape(rows, lane), w0, tm)
    return out2.reshape(-1)[:total].reshape(orig_shape)


if __name__ == "__main__":
    key = jax.random.PRNGKey(0)

    # Primary case (aligned -> fast path, no pad/slice).
    x = jax.random.normal(key, (2, 4, 16, 16), dtype=jnp.float32)
    out = jax.block_until_ready(sine(x))
    ref = jnp.sin(30.0 * x)
    assert out.shape == x.shape
    assert jnp.allclose(out, ref, atol=1e-5, rtol=1e-5)

    # Ragged case (exercises the pad-to-lane fallback path).
    y = jax.random.normal(jax.random.PRNGKey(1), (7, 37), dtype=jnp.float32)
    out_y = jax.block_until_ready(sine(y))
    assert jnp.allclose(out_y, jnp.sin(30.0 * y), atol=1e-5, rtol=1e-5)

    print("KERNEL_OK")
</pallas_src>

<mosaic_0001>
module attributes {stable_mosaic.version = 11 : i64} {
  func.func @sine_kernel(%arg0: i32, %arg1: memref<4x512xf32, #tpu.memory_space<vmem>>, %arg2: memref<4x512xf32, #tpu.memory_space<vmem>>) attributes {dimension_semantics = [#tpu.dimension_semantics<parallel>], iteration_bounds = array<i64: 1>, scalar_prefetch = 0 : i64, scratch_operands = 0 : i64, tpu.core_type = #tpu.core_type<tc>, window_params = [{transform_indices = @transform_0, window_bounds = array<i64: 4, 512>}, {transform_indices = @transform_1, window_bounds = array<i64: 4, 512>}]} {
    %c0 = arith.constant 0 : index
    %c0_0 = arith.constant 0 : index
    %0 = vector.load %arg1[%c0, %c0_0] : memref<4x512xf32, #tpu.memory_space<vmem>>, vector<4x512xf32>
    %cst = arith.constant 3.000000e+01 : f32
    %1 = vector.broadcast %cst : f32 to vector<4x512xf32>
    %2 = arith.mulf %1, %0 : vector<4x512xf32>
    %3 = math.sin %2 : vector<4x512xf32>
    %c0_1 = arith.constant 0 : index
    %c0_2 = arith.constant 0 : index
    %4 = vector.load %arg2[%c0_1, %c0_2] : memref<4x512xf32, #tpu.memory_space<vmem>>, vector<4x512xf32>
    tpu.vector_store %arg2[%c0_1, %c0_2], %3 {strides = array<i32>} : memref<4x512xf32, #tpu.memory_space<vmem>>, vector<4x512xf32>,
    return
  }
  func.func @transform_0(%arg0: i32) -> (i32, i32) {
    %c0_i32 = arith.constant 0 : i32
    %c0_i32_0 = arith.constant 0 : i32
    return %arg0, %c0_i32 : i32, i32
  }
  func.func @transform_1(%arg0: i32) -> (i32, i32) {
    %c0_i32 = arith.constant 0 : i32
    %c0_i32_0 = arith.constant 0 : i32
    return %arg0, %c0_i32 : i32, i32
  }
}

</mosaic_0001>

<bundles_post_ra>
// kernel: sine.1
= control target key start
LH: loop header
LB: loop body
LE: loop exit
PB: predicated region body
PF: predicated region fallthrough
CT: control target
= control target key end

     0   :  { %v256_v26 = vmov 683565275   ;;  %v257_v28 = vmov 2475754826   ;;  %v258_v30 = vmov 2131351028   ;;  %s354_s0 = inlined_call_operand.vmem [shape: f32[4,512], index: 0, kind: input, shape index: {}]   ;;  %s355_s1 = inlined_call_operand.vmem [shape: f32[4,512], index: 1, kind: output, shape index: {}]  }
   0x1   :  { %v8_v0 = vld [vmem:[%s354_s0] sm:$0xff]  ;;  %v9_v1 = vld [vmem:[%s354_s0 + $0x8] sm:$0xff]  ;;  %v259_v32 = vmov 2102212464   ;;  %v260_v34 = vmov 920167782  }
   0x2   :  { %v278_v2 = vmul.f32 30.0, %v8_v0  ;;  %v280_v3 = vmul.f32 30.0, %v9_v1  ;;  %v261_v42 = vmov 1326507024  }
   0x4   :  { %v12_v4 = vand.u32 2147483647, %v278_v2  ;;  %v15_v5 = vand.u32 2139095040, %v278_v2  ;;  %v116_v6 = vand.u32 2147483647, %v280_v3  ;;  %v119_v7 = vand.u32 2139095040, %v280_v3 }
   0x5   :  { %vm14_vm14 = vcmp.lt.s32.totalorder %v278_v2, 0 }
   0x6   :  { %v16_v8 = vshrl.u32 %v15_v5, 23  ;;  %v19_v9 = vand.u32 8388607, %v12_v4  ;;  %v120_v10 = vshrl.u32 %v119_v7, 23  ;;  %v123_v11 = vand.u32 8388607, %v116_v6 }
   0x7   :  { %vm13_vm15 = vcmp.le.f32.partialorder %v12_v4, 0.7853982 }
   0x8   :  { %v226_v12 = vadd.s32 4294967169, %v16_v8  ;;  %v230_v13 = vadd.s32 4294967169, %v120_v10  ;;  %v20_v15 = vor.u32 8388608, %v19_v9  ;;  %v124_v16 = vor.u32 8388608, %v123_v11 }
   0xa   :  { %v22_v14 = vadd.s32 1, %v226_v12  ;;  %v126_v17 = vadd.s32 1, %v230_v13  ;;  %v290_v22 = vshll.u32 %v20_v15, 8  ;;  %v292_v24 = vshll.u32 %v124_v16, 8 }
   0xc   :  { %vm23_vm0 = vcmp.gt.s32.totalorder %v22_v14, 0  ;;  %vm127_vm1 = vcmp.gt.s32.totalorder %v126_v17, 0 }
   0xd   :  { %v24_v18 = vsel %vm23_vm0, %v22_v14, 0  ;;  %v128_v21 = vsel %vm127_vm1, %v126_v17, 0  ;;  %vm118_vm0 = vcmp.lt.s32.totalorder %v280_v3, 0  ;;  %vm117_vm1 = vcmp.le.f32.partialorder %v116_v6, 0.7853982 }
   0xe   :  { %v25_v19 = vshrl.u32 %v24_v18, 5  ;;  %v26_v20 = vand.u32 31, %v24_v18  ;;  %v130_v23 = vand.u32 31, %v128_v21  ;;  %v294_v36 = vshrl.u32 %v128_v21, 5 }
  0x10   :  { %v27_v25 = vsub.s32 32, %v26_v20  ;;  %v29_v27 = vshll.u32 %v256_v26, %v26_v20  ;;  %v32_v29 = vshll.u32 %v257_v28, %v26_v20  ;;  %v35_v31 = vshll.u32 %v258_v30, %v26_v20 }
  0x11   :  { %v38_v33 = vshll.u32 %v259_v32, %v26_v20  ;;  %v41_v35 = vshll.u32 %v260_v34, %v26_v20  ;;  %vm44_vm2 = vcmp.lt.s32.totalorder %v25_v19, 1  ;;  %vm45_vm3 = vcmp.lt.s32.totalorder %v25_v19, 2 }
  0x12   :  { %v28_v37 = vshrl.u32 %v256_v26, %v27_v25  ;;  %v30_v38 = vshrl.u32 %v257_v28, %v27_v25  ;;  %v33_v39 = vshrl.u32 %v258_v30, %v27_v25  ;;  %v36_v40 = vshrl.u32 %v259_v32, %v27_v25 }
  0x13   :  { %v39_v41 = vshrl.u32 %v260_v34, %v27_v25  ;;  %v42_v43 = vshrl.u32 %v261_v42, %v27_v25  ;;  %vm47_vm4 = vcmp.lt.s32.totalorder %v25_v19, 4  ;;  %v131_v47 = vsub.s32 32, %v130_v23 }
  0x14   :  { %v31_v44 = vor.u32 %v30_v38, %v29_v27  ;;  %v34_v45 = vor.u32 %v33_v39, %v32_v29  ;;  %v37_v46 = vor.u32 %v36_v40, %v35_v31  ;;  %vm46_vm5 = vcmp.lt.s32.totalorder %v25_v19, 3 }
  0x15   :  { %v40_v48 = vor.u32 %v39_v41, %v38_v33  ;;  %v43_v49 = vor.u32 %v42_v43, %v41_v35  ;;  %v133_v50 = vshll.u32 %v256_v26, %v130_v23  ;;  %v136_v58 = vshll.u32 %v257_v28, %v130_v23 }
  0x16   :  { %v48_v51 = vsel %vm44_vm2, %v28_v37, %v31_v44  ;;  %v49_v52 = vsel %vm47_vm4, %v37_v46, 2102212464  ;;  %v52_v53 = vsel %vm44_vm2, %v31_v44, %v34_v45  ;;  %v56_v54 = vsel %vm44_vm2, %v34_v45, %v37_v46 }
  0x17   :  { %v50_v55 = vsel %vm46_vm5, %v34_v45, %v49_v52  ;;  %v53_v56 = vsel %vm47_vm4, %v40_v48, 920167782  ;;  %v57_v57 = vsel %vm47_vm4, %v43_v49, 1326507024  ;;  %v132_v61 = vshrl.u32 %v256_v26, %v131_v47 }
  0x18   :  { %v54_v59 = vsel %vm46_vm5, %v37_v46, %v53_v56  ;;  %v58_v60 = vsel %vm46_vm5, %v40_v48, %v57_v57  ;;  %v134_v62 = vshrl.u32 %v257_v28, %v131_v47  ;;  %v51_v63 = vsel %vm45_vm3, %v48_v51, %v50_v55 }
  0x19   :  { %v55_v0 = vsel %vm45_vm3, %v52_v53, %v54_v59  ;;  %v59_v1 = vsel %vm45_vm3, %v56_v54, %v58_v60  ;;  %v137_v5 = vshrl.u32 %v258_v30, %v131_v47  ;;  %v139_v13 = vshll.u32 %v258_v30, %v130_v23 }
  0x1a   :  { %v303_v7 = vmul.u32.u64.low %v290_v22, %v59_v1  ;;  %v304_v8 = vmul.u32.u64.high %v290_v22, %v59_v1, %v303_v7  ;;  %v307_v9 = vmul.u32.u64.low %v290_v22, %v55_v0  ;;  %v308_v10 = vmul.u32.u64.high %v290_v22, %v55_v0, %v307_v9 }
  0x1b   :  { %v135_v11 = vor.u32 %v134_v62, %v133_v50  ;;  %v138_v12 = vor.u32 %v137_v5, %v136_v58  ;;  %v140_v14 = vshrl.u32 %v259_v32, %v131_v47  ;;  %v142_v15 = vshll.u32 %v259_v32, %v130_v23 }
  0x1c   :  { %v143_v16 = vshrl.u32 %v260_v34, %v131_v47  ;;  %v145_v17 = vshll.u32 %v260_v34, %v130_v23  ;;  %v146_v18 = vshrl.u32 %v261_v42, %v131_v47  ;;  %v67_v19 = vmul.u32 %v290_v22, %v51_v63 }
  0x1d   :  { %v141_v20 = vor.u32 %v140_v14, %v139_v13  ;;  %vm148_vm6 = vcmp.lt.s32.totalorder %v294_v36, 1  ;;  %vm149_vm7 = vcmp.lt.s32.totalorder %v294_v36, 2  ;;  %vm69_vm8 = vc.u32 %v304_v8, %v307_v9 }
  0x1e   :  { %v70_v21 = vadd.s32 1, %v308_v10  ;;  %v144_v25 = vor.u32 %v143_v16, %v142_v15  ;;  %vm150_vm9 = vcmp.lt.s32.totalorder %v294_v36, 3  ;;  %v147_v26 = vor.u32 %v146_v18, %v145_v17 }
  0x1f   :  { %vm151_vm10 = vcmp.lt.s32.totalorder %v294_v36, 4  ;;  %v152_v27 = vsel %vm148_vm6, %v132_v61, %v135_v11  ;;  %v156_v23 = vsel %vm148_vm6, %v135_v11, %v138_v12  ;;  %v160_v30 = vsel %vm148_vm6, %v138_v12, %v141_v20 }
  0x20   :  { %v71_v28 = vsel %vm69_vm8, %v70_v21, %v308_v10  ;;  %v153_v22 = vsel %vm151_vm10, %v141_v20, 2102212464  ;;  %v157_v29 = vsel %vm151_vm10, %v144_v25, 920167782  ;;  %v161_v34 = vsel %vm151_vm10, %v147_v26, 1326507024 }
  0x21   :  { %v72_v31 = vadd.s32 %v71_v28, %v67_v19  ;;  %v154_v32 = vsel %vm150_vm9, %v138_v12, %v153_v22  ;;  %v158_v33 = vsel %vm150_vm9, %v141_v20, %v157_v29  ;;  %v162_v38 = vsel %vm150_vm9, %v144_v25, %v161_v34 }
  0x22   :  { %v155_v35 = vsel %vm149_vm7, %v152_v27, %v154_v32  ;;  %v159_v37 = vsel %vm149_vm7, %v156_v23, %v158_v33  ;;  %v163_v40 = vsel %vm149_vm7, %v160_v30, %v162_v38  ;;  %v68_v59 = vadd.s32 %v307_v9, %v304_v8 }
  0x23   :  { %v73_v39 = vadd.s32 536870912, %v72_v31  ;;  %v325_v41 = vmul.u32.u64.low %v292_v24, %v159_v37  ;;  %v326_v42 = vmul.u32.u64.high %v292_v24, %v159_v37, %v325_v41  ;;  %v171_v46 = vmul.u32 %v292_v24, %v155_v35 }
  0x24   :  { %v329_v43 = vmul.u32.u64.low %v292_v24, %v163_v40  ;;  %v330_v44 = vmul.u32.u64.high %v292_v24, %v163_v40, %v329_v43  ;;  %vm104_vm5 = vweird.f32 %v278_v2  ;;  %vm208_vm9 = vweird.f32 %v280_v3 }
  0x25   :  { %v74_v45 = vshrl.u32 %v73_v39, 30  ;;  %v174_v48 = vadd.s32 1, %v326_v42 }
  0x26   :  { %vm173_vm11 = vc.u32 %v330_v44, %v325_v41  ;;  %v172_v15 = vadd.s32 %v325_v41, %v330_v44 }
  0x27   :  { %v75_v47 = vshll.u32 %v74_v45, 30  ;;  %v175_v36 = vsel %vm173_vm11, %v174_v48, %v326_v42  ;;  %v98_v8 = vsub.s32 4, %v74_v45 }
  0x28   :  { %v176_v50 = vadd.s32 %v175_v36, %v171_v46 }
  0x29   :  { %v76_v49 = vsub.s32 %v72_v31, %v75_v47  ;;  %v99_v27 = vsel %vm14_vm14, %v98_v8, %v74_v45 }
  0x2a   :  { %v177_v52 = vadd.s32 536870912, %v176_v50  ;;  %v101_v30 = vsel %vm13_vm15, 0, %v99_v27 }
  0x2b   :  { %v78_v51 = vsub.s32 0, %v76_v49  ;;  %v105_v35 = vadd.s32 3, %v101_v30 }
  0x2c   :  { %v178_v54 = vshrl.u32 %v177_v52, 30 }
  0x2d   :  { %v227_v53 = vmin.u32 %v78_v51, %v76_v49  ;;  %v106_v39 = vand.u32 3, %v105_v35 }
  0x2e   :  { %v179_v56 = vshll.u32 %v178_v54, 30  ;;  %v202_v34 = vsub.s32 4, %v178_v54 }
  0x2f   :  { %v80_v55 = vclz %v227_v53  ;;  %vm111_vm2 = vcmp.eq.s32.totalorder %v106_v39, 2  ;;  %vm108_vm3 = vcmp.eq.s32.totalorder %v106_v39, 0  ;;  %vm107_vm4 = vcmp.lt.s32.totalorder %v106_v39, 2 }
  0x30   :  { %v180_v58 = vsub.s32 %v176_v50, %v179_v56  ;;  %v203_v38 = vsel %vm118_vm0, %v202_v34, %v178_v54 }
  0x31   :  { %v228_v57 = vadd.s32 4294967294, %v80_v55  ;;  %v205_v42 = vsel %vm117_vm1, 0, %v203_v38 }
  0x32   :  { %v182_v60 = vsub.s32 0, %v180_v58  ;;  %v209_v46 = vadd.s32 3, %v205_v42 }
  0x33   :  { %vm229_vm12 = vcmp.lt.s32.totalorder %v228_v57, 0 }
  0x34   :  { %v83_v24 = vsel %vm229_vm12, 0, %v228_v57  ;;  %v231_v0 = vmin.u32 %v182_v60, %v180_v58  ;;  %v210_v36 = vand.u32 3, %v209_v46 }
  0x35   :  { %v84_v61 = vsub.s32 32, %v83_v24  ;;  %v85_v62 = vshll.u32 %v76_v49, %v83_v24  ;;  %v88_v63 = vsub.s32 4294967266, %v83_v24 }
  0x36   :  { %v184_v7 = vclz %v231_v0  ;;  %vm215_vm6 = vcmp.eq.s32.totalorder %v210_v36, 2  ;;  %vm212_vm7 = vcmp.eq.s32.totalorder %v210_v36, 0  ;;  %vm211_vm8 = vcmp.lt.s32.totalorder %v210_v36, 2 }
  0x37   :  { %v86_v1 = vshrl.u32 %v68_v59, %v84_v61  ;;  %v89_v5 = vadd.s32 127, %v88_v63 }
  0x38   :  { %v232_v12 = vadd.s32 4294967294, %v184_v7 }
  0x39   :  { %v87_v10 = vor.u32 %v86_v1, %v85_v62  ;;  %v90_v11 = vshll.u32 %v89_v5, 23 }
  0x3a   :  { %vm233_vm13 = vcmp.lt.s32.totalorder %v232_v12, 0 }
  0x3b   :  { %v91_v13 = vor.u32 4788187, %v90_v11  ;;  %v94_v14 = vcvt.s32.f32 %v87_v10  ;;  %v187_v9 = vsel %vm233_vm13, 0, %v232_v12 }
  0x3c   :  { %v188_v17 = vsub.s32 32, %v187_v9  ;;  %v189_v18 = vshll.u32 %v180_v58, %v187_v9  ;;  %v192_v19 = vsub.s32 4294967266, %v187_v9 }
  0x3d   :  { %v92_v16 = vand.u32 2147483647, %v91_v13 }
  0x3e   :  { %v190_v21 = vshrl.u32 %v172_v15, %v188_v17  ;;  %v193_v25 = vadd.s32 127, %v192_v19 }
  0x3f   :  { %v95_v20 = vmul.f32 %v94_v14, %v92_v16 }
  0x40   :  { %v191_v23 = vor.u32 %v190_v21, %v189_v18  ;;  %v194_v28 = vshll.u32 %v193_v25, 23 }
  0x41   :  { %v96_v26 = vxor.u32 2147483648, %v95_v20 }
  0x42   :  { %v195_v31 = vor.u32 4788187, %v194_v28  ;;  %v198_v32 = vcvt.s32.f32 %v191_v23 }
  0x43   :  { %v97_v22 = vsel %vm14_vm14, %v96_v26, %v95_v20 }
  0x44   :  { %v100_v29 = vsel %vm13_vm15, %v278_v2, %v97_v22  ;;  %v196_v33 = vand.u32 2147483647, %v195_v31 }
  0x45   :  { %248 = vcosq.f32 %v100_v29 }
  0x46   :  { %250 = vsinq.f32 %v100_v29  ;;  %v199_v37 = vmul.f32 %v198_v32, %v196_v33 }
  0x48   :  { %v200_v4 = vxor.u32 2147483648, %v199_v37 }
  0x4a   :  { %v201_v40 = vsel %vm118_vm0, %v200_v4, %v199_v37 }
  0x4b   :  { %v204_v41 = vsel %vm117_vm1, %v280_v3, %v201_v40 }
  0x4c   :  { %252 = vcosq.f32 %v204_v41 }
  0x4d   :  { %254 = vsinq.f32 %v204_v41 }
  0x4f   :  { %v249_v43 = vpop.eup %248 }
  0x50   :  { %v251_v44 = vpop.eup %250  ;;  %v112_v45 = vxor.u32 2147483648, %v249_v43 }
  0x51   :  { %v109_v47 = vxor.u32 2147483648, %v251_v44 }
  0x52   :  { %v113_v6 = vsel %vm111_vm2, %v112_v45, %v251_v44 }
  0x53   :  { %v110_v48 = vsel %vm108_vm3, %v249_v43, %v109_v47 }
  0x54   :  { %v114_v49 = vsel %vm107_vm4, %v110_v48, %v113_v6 }
  0x55   :  { %v115_v50 = vsel %vm104_vm5, nan, %v114_v49 }
  0x56   :  { %220 = vst [vmem:[%s355_s1] sm:$0xff] %v115_v50  ;;  %v253_v51 = vpop.eup %252 }
  0x57   :  { %v255_v52 = vpop.eup %254  ;;  %v216_v53 = vxor.u32 2147483648, %v253_v51 }
  0x58   :  { %v213_v54 = vxor.u32 2147483648, %v255_v52 }
  0x59   :  { %v217_v55 = vsel %vm215_vm6, %v216_v53, %v255_v52 }
  0x5a   :  { %v214_v2 = vsel %vm212_vm7, %v253_v51, %v213_v54 }
  0x5b   :  { %v218_v56 = vsel %vm211_vm8, %v214_v2, %v217_v55 }
  0x5c   :  { %v219_v57 = vsel %vm208_vm9, nan, %v218_v56 }
  0x5d   :  { %221 = vst [vmem:[%s355_s1 + $0x8] sm:$0xff] %v219_v57 }

</bundles_post_ra>
